<compile_context>
chip_gen: v5e
topology: v5e:2x2
jax: 0.10.0
libtpu: 0.0.40
codegen_flags: <defaults>
</compile_context>

<pallas_src>
import functools

import jax
import jax.numpy as jnp
from jax.experimental import pallas as pl
from jax.experimental.pallas import tpu as pltpu

_LANES = 128
_SUBLANES = 8
_TARGET_BLOCK_BYTES = 4 * 1024 * 1024  # ~4 MiB of input per grid step


def _tensorcores_per_chip() -> int:
    """2 on v7x (2 TensorCores/chip), 1 on v5e/v6e."""
    # TODO(synk): on v7x, verify in xprof that the "parallel" leading axis
    # actually lands on both TensorCores; if not, switch that axis to
    # pltpu.CORE_PARALLEL.
    try:
        kind = jax.devices()[0].device_kind.lower()
    except Exception:
        return 1
    return 2 if "v7" in kind else 1


def _sq_diff_sum(o, t):
    d = o.astype(jnp.float32) - t.astype(jnp.float32)
    return jnp.sum(d * d)


def _psnr_partial_kernel(o_ref, t_ref, sum_ref, acc_ref, *,
                         block_rows, rows_valid, steps_per_split, needs_mask):
    s = pl.program_id(1)

    @pl.when(s == 0)
    def _():
        acc_ref[...] = jnp.zeros_like(acc_ref)

    # Hot path: pure VPU — cast, subtract, square, cross-vreg accumulate.
    d = o_ref[...].astype(jnp.float32) - t_ref[...].astype(jnp.float32)
    dsq = d * d

    def _accum(vals):
        # (block_rows, 128) -> (block_rows//8, 8, 128): each leading index is
        # exactly one vreg; sum(axis=0) is pure VPU adds into the (8,128) acc.
        acc_ref[...] += vals.reshape(
            block_rows // _SUBLANES, _SUBLANES, _LANES).sum(axis=0)

    if needs_mask:
        c = pl.program_id(0)
        row0 = (c * steps_per_split + s) * block_rows
        is_edge = row0 + block_rows > rows_valid

        @pl.when(jnp.logical_not(is_edge))
        def _():
            _accum(dsq)

        @pl.when(is_edge)
        def _():
            # Final ragged block (stale rows past the logical end) and fully
            # clamped over-range steps: zero invalid rows before accumulating.
            row_ids = row0 + jax.lax.broadcasted_iota(jnp.int32, dsq.shape, 0)
            _accum(jnp.where(row_ids < rows_valid, dsq, 0.0))
    else:
        _accum(dsq)

    # Per-split epilogue: one cross-lane reduction to a scalar partial sum.
    @pl.when(s == pl.num_programs(1) - 1)
    def _():
        sum_ref[0, 0] = jnp.sum(acc_ref[...])


def _pallas_sq_diff_sum(o2d, t2d):
    """Sum of squared differences of two (rows, 128) arrays (rows >= 8)."""
    rows = o2d.shape[0]

    # Dtype-aware block size targeting ~4 MiB of each input per step.
    itemsize = max(jnp.dtype(o2d.dtype).itemsize, jnp.dtype(t2d.dtype).itemsize)
    target_rows = max(
        _SUBLANES,
        (_TARGET_BLOCK_BYTES // (_LANES * itemsize)) // _SUBLANES * _SUBLANES)
    if rows > target_rows:
        block_rows = target_rows
    else:
        block_rows = (rows // _SUBLANES) * _SUBLANES  # rows >= 8 guaranteed
    num_blocks = pl.cdiv(rows, block_rows)

    n_splits = min(_tensorcores_per_chip(), num_blocks)
    steps_per_split = pl.cdiv(num_blocks, n_splits)
    needs_mask = (n_splits * steps_per_split * block_rows) != rows

    def in_map(c, s):
        # Clamp so DMAs never start past the last block; over-range logical
        # steps are fully masked out inside the kernel.
        return (jnp.minimum(c * steps_per_split + s, num_blocks - 1), 0)

    kernel = functools.partial(
        _psnr_partial_kernel,
        block_rows=block_rows,
        rows_valid=rows,
        steps_per_split=steps_per_split,
        needs_mask=needs_mask,
    )

    # Explicit VMEM budget: 2 double-buffered input blocks + slack. Needed on
    # v5e (16 MiB default scoped VMEM); comfortably below v7x's 64 MiB.
    block_bytes = block_rows * _LANES * (
        jnp.dtype(o2d.dtype).itemsize + jnp.dtype(t2d.dtype).itemsize)
    vmem_limit = int(2 * block_bytes + (8 << 20))

    partials = pl.pallas_call(
        kernel,
        out_shape=jax.ShapeDtypeStruct((n_splits, 1), jnp.float32),
        grid_spec=pltpu.PrefetchScalarGridSpec(
            num_scalar_prefetch=0,
            grid=(n_splits, steps_per_split),
            in_specs=[
                pl.BlockSpec((block_rows, _LANES), in_map),
                pl.BlockSpec((block_rows, _LANES), in_map),
            ],
            out_specs=pl.BlockSpec(
                (1, 1), lambda c, s: (c, 0), memory_space=pltpu.SMEM
            ),
            scratch_shapes=[pltpu.VMEM((_SUBLANES, _LANES), jnp.float32)],
        ),
        compiler_params=pltpu.CompilerParams(
            dimension_semantics=("parallel", "arbitrary"),
            vmem_limit_bytes=vmem_limit,
        ),
    )(o2d, t2d)

    return jnp.sum(partials)


def psnr(output, target, max_val=1.0):
    """PSNR between `output` and `target` (any matching shapes, NCHW here)."""
    assert output.shape == target.shape, (output.shape, target.shape)
    n_elems = output.size

    o_flat = output.reshape(-1)
    t_flat = target.reshape(-1)

    rows_all = n_elems // _LANES
    if n_elems % _LANES == 0 and rows_all >= _SUBLANES:
        # Common case: flat slab reshapes to (rows, 128) for free — no pad,
        # no extra HBM copy. A non-multiple-of-8 row remainder is handled by
        # the in-kernel ragged-block mask.
        body_sum = _pallas_sq_diff_sum(
            o_flat.reshape(rows_all, _LANES), t_flat.reshape(rows_all, _LANES))
        tail_sum = jnp.float32(0.0)
    else:
        # Unaligned case: run the leading multiple-of-(8*128) chunk through
        # the kernel and fold the <=1023-element tail into the scalar
        # epilogue in plain JAX (no full-tensor jnp.pad copy).
        rows = (n_elems // (_SUBLANES * _LANES)) * _SUBLANES
        if rows == 0:
            # Tiny input: not worth a kernel launch.
            mse = _sq_diff_sum(o_flat, t_flat) / jnp.float32(n_elems)
            return (jnp.float32(20.0)
                    * jnp.log10(jnp.float32(max_val) / jnp.sqrt(mse)))
        main = rows * _LANES
        body_sum = _pallas_sq_diff_sum(
            o_flat[:main].reshape(rows, _LANES),
            t_flat[:main].reshape(rows, _LANES))
        tail_sum = _sq_diff_sum(o_flat[main:], t_flat[main:])

    mse = (body_sum + tail_sum) / jnp.float32(n_elems)
    return jnp.float32(20.0) * jnp.log10(jnp.float32(max_val) / jnp.sqrt(mse))


if __name__ == "__main__":
    def _ref_psnr(o, t, max_val=1.0):
        mse = jnp.mean((o.astype(jnp.float32) - t.astype(jnp.float32)) ** 2)
        return 20.0 * jnp.log10(max_val / jnp.sqrt(mse))

    key = jax.random.PRNGKey(0)
    ks = jax.random.split(key, 10)

    # 1) Primary small NCHW example (GAN image head): single block, no mask.
    o1 = jax.random.uniform(ks[0], (2, 4, 16, 16), dtype=jnp.float32)
    t1 = jax.random.uniform(ks[1], (2, 4, 16, 16), dtype=jnp.float32)
    g1 = psnr(o1, t1, max_val=1.0)
    jax.block_until_ready(g1)
    w1 = _ref_psnr(o1, t1)
    assert jnp.allclose(g1, w1, rtol=1e-5, atol=1e-5), (g1, w1)

    # 2) Multi-block path with a ragged final block (8640 rows, 8192-row blocks).
    o2 = jax.random.uniform(ks[2], (2, 4, 384, 360), dtype=jnp.float32)
    t2 = jax.random.uniform(ks[3], (2, 4, 384, 360), dtype=jnp.float32)
    g2 = psnr(o2, t2, max_val=1.0)
    jax.block_until_ready(g2)
    w2 = _ref_psnr(o2, t2)
    assert jnp.allclose(g2, w2, rtol=1e-4, atol=1e-4), (g2, w2)

    # 3) Small ragged-row case (12 rows, 8-row blocks): edge-block mask path.
    o3 = jax.random.uniform(ks[4], (2, 3, 16, 16), dtype=jnp.float32)
    t3 = jax.random.uniform(ks[5], (2, 3, 16, 16), dtype=jnp.float32)
    g3 = psnr(o3, t3, max_val=1.0)
    jax.block_until_ready(g3)
    w3 = _ref_psnr(o3, t3)
    assert jnp.allclose(g3, w3, rtol=1e-5, atol=1e-5), (g3, w3)

    # 4) Lane-unaligned element count (5000): kernel body + plain-JAX tail.
    o4 = jax.random.uniform(ks[6], (2, 2, 25, 50), dtype=jnp.float32)
    t4 = jax.random.uniform(ks[7], (2, 2, 25, 50), dtype=jnp.float32)
    g4 = psnr(o4, t4, max_val=1.0)
    jax.block_until_ready(g4)
    w4 = _ref_psnr(o4, t4)
    assert jnp.allclose(g4, w4, rtol=1e-5, atol=1e-5), (g4, w4)

    # 5) Tiny (<128 elements): pure-JAX fallback.
    o5 = jax.random.uniform(ks[8], (3, 5, 7), dtype=jnp.float32)
    t5 = jax.random.uniform(ks[9], (3, 5, 7), dtype=jnp.float32)
    g5 = psnr(o5, t5, max_val=1.0)
    jax.block_until_ready(g5)
    w5 = _ref_psnr(o5, t5)
    assert jnp.allclose(g5, w5, rtol=1e-5, atol=1e-5), (g5, w5)

    print("KERNEL_OK")
</pallas_src>

<mosaic_0001>
module attributes {stable_mosaic.version = 11 : i64} {
  func.func @_psnr_partial_kernel(%arg0: i32, %arg1: i32, %arg2: memref<16x128xf32, #tpu.memory_space<vmem>>, %arg3: memref<16x128xf32, #tpu.memory_space<vmem>>, %arg4: memref<1x1xf32, #tpu.memory_space<smem>>, %arg5: memref<8x128xf32, #tpu.memory_space<vmem>>) attributes {dimension_semantics = [#tpu.dimension_semantics<parallel>, #tpu.dimension_semantics<arbitrary>], iteration_bounds = array<i64: 1, 1>, scalar_prefetch = 0 : i64, scratch_operands = 1 : i64, tpu.core_type = #tpu.core_type<tc>, window_params = [{transform_indices = @transform_0, window_bounds = array<i64: 16, 128>}, {transform_indices = @transform_1, window_bounds = array<i64: 16, 128>}, {transform_indices = @transform_2, window_bounds = array<i64: 1, 1>}]} {
    %c0_i32 = arith.constant 0 : i32
    %0 = arith.cmpi eq, %arg1, %c0_i32 : i32
    %1 = arith.extui %0 : i1 to i32
    %c0_i32_0 = arith.constant 0 : i32
    %2 = arith.cmpi ne, %1, %c0_i32_0 : i32
    scf.if %2 {
      %cst_10 = arith.constant 0.000000e+00 : f32
      %15 = vector.broadcast %cst_10 : f32 to vector<8x128xf32>
      %c0_11 = arith.constant 0 : index
      %c0_12 = arith.constant 0 : index
      %16 = vector.load %arg5[%c0_11, %c0_12] : memref<8x128xf32, #tpu.memory_space<vmem>>, vector<8x128xf32>
      tpu.vector_store %arg5[%c0_11, %c0_12], %15 {strides = array<i32>} : memref<8x128xf32, #tpu.memory_space<vmem>>, vector<8x128xf32>,
    } else {
    }
    %c0 = arith.constant 0 : index
    %c0_1 = arith.constant 0 : index
    %3 = vector.load %arg2[%c0, %c0_1] : memref<16x128xf32, #tpu.memory_space<vmem>>, vector<16x128xf32>
    %c0_2 = arith.constant 0 : index
    %c0_3 = arith.constant 0 : index
    %4 = vector.load %arg3[%c0_2, %c0_3] : memref<16x128xf32, #tpu.memory_space<vmem>>, vector<16x128xf32>
    %5 = arith.subf %3, %4 : vector<16x128xf32>
    %6 = arith.mulf %5, %5 : vector<16x128xf32>
    %c0_4 = arith.constant 0 : index
    %c0_5 = arith.constant 0 : index
    %7 = vector.load %arg5[%c0_4, %c0_5] : memref<8x128xf32, #tpu.memory_space<vmem>>, vector<8x128xf32>
    %8 = vector.shape_cast %6 : vector<16x128xf32> to vector<2x8x128xf32>
    %cst = arith.constant dense<0.000000e+00> : vector<8x128xf32>
    %9 = vector.multi_reduction <add>, %8, %cst [0] : vector<2x8x128xf32> to vector<8x128xf32>
    %10 = arith.addf %7, %9 : vector<8x128xf32>
    %c0_6 = arith.constant 0 : index
    %c0_7 = arith.constant 0 : index
    %11 = vector.load %arg5[%c0_6, %c0_7] : memref<8x128xf32, #tpu.memory_space<vmem>>, vector<8x128xf32>
    tpu.vector_store %arg5[%c0_6, %c0_7], %10 {strides = array<i32>} : memref<8x128xf32, #tpu.memory_space<vmem>>, vector<8x128xf32>,
    %c0_i32_8 = arith.constant 0 : i32
    %12 = arith.cmpi eq, %arg1, %c0_i32_8 : i32
    %13 = arith.extui %12 : i1 to i32
    %c0_i32_9 = arith.constant 0 : i32
    %14 = arith.cmpi ne, %13, %c0_i32_9 : i32
    scf.if %14 {
      %c0_10 = arith.constant 0 : index
      %c0_11 = arith.constant 0 : index
      %15 = vector.load %arg5[%c0_10, %c0_11] : memref<8x128xf32, #tpu.memory_space<vmem>>, vector<8x128xf32>
      %16 = vector.shape_cast %15 : vector<8x128xf32> to vector<1x8x128xf32>
      %cst_12 = arith.constant dense<0.000000e+00> : vector<1xf32>
      %17 = vector.multi_reduction <add>, %16, %cst_12 [1, 2] : vector<1x8x128xf32> to vector<1xf32>
      %18 = vector.shape_cast %17 : vector<1xf32> to vector<1x1x1xf32>
      %19 = vector.extract %18[0, 0, 0] : f32 from vector<1x1x1xf32>
      %c0_13 = arith.constant 0 : index
      %c0_14 = arith.constant 0 : index
      %20 = memref.load %arg4[%c0_13, %c0_14] : memref<1x1xf32, #tpu.memory_space<smem>>
      memref.store %19, %arg4[%c0_13, %c0_14] : memref<1x1xf32, #tpu.memory_space<smem>>
    } else {
    }
    return
  }
  func.func @transform_0(%arg0: i32, %arg1: i32) -> (i32, i32) {
    %c1_i32 = arith.constant 1 : i32
    %0 = arith.muli %arg0, %c1_i32 : i32
    %1 = arith.addi %0, %arg1 : i32
    %c0_i32 = arith.constant 0 : i32
    %2 = arith.minsi %1, %c0_i32 : i32
    %c0_i32_0 = arith.constant 0 : i32
    %c0_i32_1 = arith.constant 0 : i32
    return %2, %c0_i32_0 : i32, i32
  }
  func.func @transform_1(%arg0: i32, %arg1: i32) -> (i32, i32) {
    %c1_i32 = arith.constant 1 : i32
    %0 = arith.muli %arg0, %c1_i32 : i32
    %1 = arith.addi %0, %arg1 : i32
    %c0_i32 = arith.constant 0 : i32
    %2 = arith.minsi %1, %c0_i32 : i32
    %c0_i32_0 = arith.constant 0 : i32
    %c0_i32_1 = arith.constant 0 : i32
    return %2, %c0_i32_0 : i32, i32
  }
  func.func @transform_2(%arg0: i32, %arg1: i32) -> (i32, i32) {
    %c0_i32 = arith.constant 0 : i32
    %c0_i32_0 = arith.constant 0 : i32
    return %arg0, %c0_i32 : i32, i32
  }
}

</mosaic_0001>

<bundles_post_ra>
// kernel: tpu_custom_call.1
= control target key start
LH: loop header
LB: loop body
LE: loop exit
PB: predicated region body
PF: predicated region fallthrough
CT: control target
= control target key end

     0   :  { %7 = vsyncpa [#allocation4], 0  ;;  %s219_s0 = inlined_call_operand.hbm [shape: f32[16,128], index: 0, kind: input, shape index: {}]   ;;  %s220_s1 = inlined_call_operand.hbm [shape: f32[16,128], index: 1, kind: input, shape index: {}]   ;;  %s221_s2 = inlined_call_operand.hbm [shape: f32[1,1], index: 2, kind: output, shape index: {}]  }
   0x1   :  { %8 = vsyncpa [#allocation7], 0 }
   0x2   :  { %9 = vsyncpa [#allocation5], 0  ;;  %s20_s11 = sshll.u32 %s219_s0, 4  ;;  %s190_s12 = smov [#allocation3]   ;;  %s21_s11 = int_to_ptr.hbm [resolvable:$true] %s20_s11 }
   0x3   :  { %s22_s13 = sshll.u32 %s190_s12, 4  ;;  %s39_s16 = sshll.u32 %s220_s1, 4  ;;  %s23_s13 = int_to_ptr.vmem [resolvable:$true] %s22_s13  ;;  %s40_s16 = int_to_ptr.hbm [resolvable:$true] %s39_s16 }
   0x4   :  { %s191_s17 = smov 128   ;;  %s192_s18 = smov 8  }
   0x5   :  { %28 = dma.hbm_to_vmem [thread:$0]  %s21_s11, 256, %s23_s13, [#allocation4], %s191_s17, %s191_s17, %s192_s18  }
   0x6   :  { %s193_s19 = smov [#allocation6]  }
   0x7   :  { %s41_s20 = sshll.u32 %s193_s19, 4  ;;  %s42_s20 = int_to_ptr.vmem [resolvable:$true] %s41_s20 }
   0x8   :  { %47 = dma.hbm_to_vmem [thread:$0]  %s40_s16, 256, %s42_s20, [#allocation7], %s191_s17, %s191_s17, %s192_s18  }
   0x9   :  { %184 = dma.done.wait [#allocation4], 256  }
   0xa   :  { %185 = vsyncadd [#allocation4], 4294967040 }
   0xb   :  { %186 = dma.done.wait [#allocation7], 256  }
   0xc   :  { %187 = vsyncadd [#allocation7], 4294967040  ;;  %v69_v0 = vld [vmem:[#allocation3] sm:$0xff]  ;;  %v70_v1 = vld [vmem:[#allocation3 + $0x8] sm:$0xff]  ;;  %s101_s21 = sshll.u32 %s221_s2, 4  ;;  %s194_s23 = smov [#allocation8]   ;;  %s102_s21 = int_to_ptr.hbm [resolvable:$true] %s101_s21 }
   0xd   :  { %v71_v2 = vld [vmem:[#allocation6] sm:$0xff]  ;;  %v72_v3 = vld [vmem:[#allocation6 + $0x8] sm:$0xff] }
   0xe   :  { %v73_v4 = vsub.f32 %v69_v0, %v71_v2  ;;  %v74_v5 = vsub.f32 %v70_v1, %v72_v3 }
  0x10   :  { %v75_v6 = vmul.f32 %v73_v4, %v73_v4  ;;  %v76_v7 = vmul.f32 %v74_v5, %v74_v5 }
  0x12   :  { %v78_v8 = vadd.f32 %v76_v7, %v75_v6 }
  0x14   :  { %85 = vadd.xlane.f32.xlu0 %v78_v8 }
  0x87   :  { %v86_v9 = vpop.xlane.xlu0 %85 }
  0x88   :  { %v87_v10 = vrot.slane %v86_v9, 4 }
  0x8a   :  { %v88_v11 = vadd.f32 %v87_v10, %v86_v9 }
  0x8c   :  { %v89_v12 = vrot.slane %v88_v11, 2 }
  0x8e   :  { %v90_v13 = vadd.f32 %v89_v12, %v88_v11 }
  0x90   :  { %v91_v14 = vrot.slane %v90_v13, 1 }
  0x92   :  { %v92_v15 = vadd.f32 %v91_v14, %v90_v13 }
  0x94   :  { %117 = vpush %v92_v15 }
  0xc5   :  { %s118_s22 = spop %117 }
  0xc6   :  { %95 = sst [smem:[#allocation8]] %s118_s22 }
  0xc7   :  { %104 = dma.smem_to_hbm %s194_s23, 16, %s102_s21, [#allocation5]  }
  0xc8   :  { %188 = dma.done.wait [#allocation5], 16  }
  0xc9   :  { %189 = vsyncadd [#allocation5], 4294967280 }
  0xca   :  { %109 = sfence }
  0xcb   :  { %110 = vsyncpa [#allocation4], 1 }
  0xcc   :  { %111 = vsyncpa [#allocation7], 1 }
  0xcd   :  { %112 = vsyncpa [#allocation5], 1 }

</bundles_post_ra>
